<compile_context>
chip_gen: v5e
topology: v5e:2x2
jax: 0.10.0
libtpu: 0.0.40
codegen_flags: <defaults>
</compile_context>

<pallas_src>
import math
import functools

import jax
import jax.numpy as jnp
from jax.experimental import pallas as pl
from jax.experimental.pallas import tpu as pltpu


def _pe_kernel(x_ref, o_ref, *, L: int, in_dim: int):
    """x_ref: (in_dim, tile) feature-major (points on the lane axis).
       o_ref: (tile, 2*L*in_dim) point-major."""
    out_rows = 2 * L * in_dim
    x = x_ref[...].astype(jnp.float32) * 2.0 - 1.0           # map [0,1] -> [-1,1]

    # Exact per-band sin/cos, lane-dense.  The 2L small (in_dim, tile) slabs are
    # concatenated along the sublane axis (XLU/VPU work, hidden under the DMA).
    pieces = []
    for l in range(L):
        a = (float(2 ** l) * math.pi) * x
        pieces.append(jnp.sin(a))
        pieces.append(jnp.cos(a))
    stacked = jnp.concatenate(pieces, axis=0)                 # (2L*in_dim, tile)

    # Pad the sublane axis up to a multiple of 8 so the transpose stays aligned.
    pad_rows = (-out_rows) % 8
    if pad_rows:
        stacked = jnp.concatenate(
            [stacked, jnp.zeros((pad_rows, stacked.shape[1]), jnp.float32)],
            axis=0)

    # In-kernel transpose (XLU) -> point-major block; one full-block store.
    t = stacked.T                                             # (tile, out_rows+pad)
    if pad_rows:
        t = t[:, :out_rows]
    o_ref[...] = t.astype(o_ref.dtype)


def _derive_tile(n128: int, L: int, in_dim: int, tile_cap: int,
                 vmem_block_budget: int) -> int:
    """Largest multiple of 128 points per grid step within a VMEM budget."""
    out_dim = 2 * L * in_dim
    lanes_pad = pl.cdiv(out_dim, 128) * 128    # lane-padded width of the output block
    rows_pad = pl.cdiv(out_dim, 8) * 8
    # Rough f32 VMEM bytes per point: double-buffered in/out blocks, the stacked
    # feature-major block, the transposed temp, and per-band sin/cos slabs.
    per_point = (2 * 8 * 4               # input block (in_dim padded to 8 sublanes) x2
                 + 2 * lanes_pad * 4     # output block x2 (double buffered)
                 + lanes_pad * 4         # transposed temp
                 + rows_pad * 4          # stacked feature-major result
                 + 2 * L * 8 * 4)        # per-band slabs
    tile = min(tile_cap, vmem_block_budget // per_point)
    tile = max(128, (tile // 128) * 128)
    return min(tile, n128)


def positional_encoding(inputs: jax.Array, L: int, *,
                        tile_cap: int = 32768,
                        vmem_block_budget: int = 28 << 20) -> jax.Array:
    """Pallas equivalent of PositionalEncoding(L).forward(inputs).

    inputs: (..., 3) float array with values in [0, 1].
    returns: (..., L*3*2), same dtype as inputs.
    """
    in_dim = inputs.shape[-1]
    assert in_dim == 3, "PositionalEncoding expects 3-channel inputs (n_output_dims = L*3*2)"
    out_dim = 2 * L * in_dim
    lead = inputs.shape[:-1]

    x2d = inputs.reshape(-1, in_dim)
    n = x2d.shape[0]

    n128 = pl.cdiv(max(n, 1), 128) * 128
    tile = _derive_tile(n128, L, in_dim, tile_cap, vmem_block_budget)
    n_pad = pl.cdiv(n128, tile) * tile

    # Feature-major input (3, N): points land on the lane axis -> lane-dense
    # VPU/EUP work and contiguous per-row input DMAs.  This is a small
    # (12 B/point) XLA transpose; the 96 B/point OUTPUT needs no post-transpose.
    # TODO(synk): have the upstream producer emit (3, N) directly to drop it.
    xt = x2d.T
    if n_pad != n:
        # Padded lanes see x=0 -> encode(-1); they are sliced off below.
        xt = jnp.pad(xt, ((0, 0), (0, n_pad - n)))

    out = pl.pallas_call(
        functools.partial(_pe_kernel, L=L, in_dim=in_dim),
        out_shape=jax.ShapeDtypeStruct((n_pad, out_dim), inputs.dtype),
        grid=(n_pad // tile,),
        in_specs=[pl.BlockSpec((in_dim, tile), lambda i: (0, i))],
        out_specs=pl.BlockSpec((tile, out_dim), lambda i: (i, 0)),
        compiler_params=pltpu.CompilerParams(
            dimension_semantics=("parallel",),      # shard grid steps across TCs
            vmem_limit_bytes=48 * 1024 * 1024),     # raise v5e's 16 MiB default
    )(xt)

    if n_pad != n:
        out = out[:n]
    return out.reshape(*lead, out_dim)


def _reference(inputs: jax.Array, L: int) -> jax.Array:
    """Pure-JAX reference mirroring the PyTorch forward exactly."""
    x = inputs * 2 - 1
    encoded = []
    for l in range(L):
        encoded.append(jnp.sin(2 ** l * math.pi * x))
        encoded.append(jnp.cos(2 ** l * math.pi * x))
    return jnp.concatenate(encoded, axis=-1)


if __name__ == "__main__":
    L = 4  # number of frequency bands; n_output_dims = L * 3 * 2 = 24

    # Case 1: point count is a multiple of 128 (no padding path).
    key = jax.random.PRNGKey(0)
    x = jax.random.uniform(key, (2, 64, 3), dtype=jnp.float32)   # 128 points
    out = jax.block_until_ready(positional_encoding(x, L))
    ref = _reference(x, L)
    assert out.shape == (2, 64, L * 3 * 2), out.shape
    assert jnp.allclose(out, ref, atol=1e-5, rtol=1e-5), "mismatch vs reference (case 1)"

    # Case 2: point count NOT a multiple of 128 (exercises pad + slice path).
    x2 = jax.random.uniform(jax.random.PRNGKey(1), (1, 100, 3), dtype=jnp.float32)
    out2 = jax.block_until_ready(positional_encoding(x2, L))
    ref2 = _reference(x2, L)
    assert out2.shape == (1, 100, L * 3 * 2), out2.shape
    assert jnp.allclose(out2, ref2, atol=1e-5, rtol=1e-5), "mismatch vs reference (case 2)"

    print("KERNEL_OK")
</pallas_src>

<mosaic_0001>
module attributes {stable_mosaic.version = 11 : i64} {
  func.func @_pe_kernel(%arg0: i32, %arg1: memref<3x128xf32, #tpu.memory_space<vmem>>, %arg2: memref<128x24xf32, #tpu.memory_space<vmem>>) attributes {dimension_semantics = [#tpu.dimension_semantics<parallel>], iteration_bounds = array<i64: 1>, scalar_prefetch = 0 : i64, scratch_operands = 0 : i64, tpu.core_type = #tpu.core_type<tc>, window_params = [{transform_indices = @transform_0, window_bounds = array<i64: 3, 128>}, {transform_indices = @transform_1, window_bounds = array<i64: 128, 24>}]} {
    %c0 = arith.constant 0 : index
    %c0_0 = arith.constant 0 : index
    %0 = vector.load %arg1[%c0, %c0_0] : memref<3x128xf32, #tpu.memory_space<vmem>>, vector<3x128xf32>
    %cst = arith.constant 2.000000e+00 : f32
    %1 = vector.broadcast %cst : f32 to vector<3x128xf32>
    %2 = arith.mulf %0, %1 : vector<3x128xf32>
    %cst_1 = arith.constant 1.000000e+00 : f32
    %3 = vector.broadcast %cst_1 : f32 to vector<3x128xf32>
    %4 = arith.subf %2, %3 : vector<3x128xf32>
    %cst_2 = arith.constant 3.14159274 : f32
    %5 = vector.broadcast %cst_2 : f32 to vector<3x128xf32>
    %6 = arith.mulf %5, %4 : vector<3x128xf32>
    %7 = math.sin %6 : vector<3x128xf32>
    %8 = math.cos %6 : vector<3x128xf32>
    %cst_3 = arith.constant 6.28318548 : f32
    %9 = vector.broadcast %cst_3 : f32 to vector<3x128xf32>
    %10 = arith.mulf %9, %4 : vector<3x128xf32>
    %11 = math.sin %10 : vector<3x128xf32>
    %12 = math.cos %10 : vector<3x128xf32>
    %cst_4 = arith.constant 12.566371 : f32
    %13 = vector.broadcast %cst_4 : f32 to vector<3x128xf32>
    %14 = arith.mulf %13, %4 : vector<3x128xf32>
    %15 = math.sin %14 : vector<3x128xf32>
    %16 = math.cos %14 : vector<3x128xf32>
    %cst_5 = arith.constant 25.1327419 : f32
    %17 = vector.broadcast %cst_5 : f32 to vector<3x128xf32>
    %18 = arith.mulf %17, %4 : vector<3x128xf32>
    %19 = math.sin %18 : vector<3x128xf32>
    %20 = math.cos %18 : vector<3x128xf32>
    %21 = tpu.concatenate %7, %8, %11, %12, %15, %16, %19, %20 in 0 : vector<3x128xf32>, vector<3x128xf32>, vector<3x128xf32>, vector<3x128xf32>, vector<3x128xf32>, vector<3x128xf32>, vector<3x128xf32>, vector<3x128xf32> -> vector<24x128xf32>
    %22 = tpu.transpose %21, [1, 0] : vector<24x128xf32> -> vector<128x24xf32>
    %c0_6 = arith.constant 0 : index
    %c0_7 = arith.constant 0 : index
    %23 = vector.load %arg2[%c0_6, %c0_7] : memref<128x24xf32, #tpu.memory_space<vmem>>, vector<128x24xf32>
    tpu.vector_store %arg2[%c0_6, %c0_7], %22 {strides = array<i32>} : memref<128x24xf32, #tpu.memory_space<vmem>>, vector<128x24xf32>,
    return
  }
  func.func @transform_0(%arg0: i32) -> (i32, i32) {
    %c0_i32 = arith.constant 0 : i32
    %c0_i32_0 = arith.constant 0 : i32
    return %c0_i32, %arg0 : i32, i32
  }
  func.func @transform_1(%arg0: i32) -> (i32, i32) {
    %c0_i32 = arith.constant 0 : i32
    %c0_i32_0 = arith.constant 0 : i32
    return %arg0, %c0_i32 : i32, i32
  }
}

</mosaic_0001>

<bundles_post_ra>
// kernel: tpu_custom_call.1
= control target key start
LH: loop header
LB: loop body
LE: loop exit
PB: predicated region body
PF: predicated region fallthrough
CT: control target
= control target key end

     0   :  { %6 = vsyncpa [#allocation3], 0  ;;  %s1414_s9 = smov [#allocation2]   ;;  %s1972_s0 = inlined_call_operand.hbm [shape: f32[3,128], index: 0, kind: input, shape index: {}]   ;;  %s1973_s1 = inlined_call_operand.vmem [shape: f32[128,24], index: 1, kind: output, shape index: {}]  }
   0x1   :  { %s12_s8 = sshll.u32 %s1972_s0, 4  ;;  %s14_s10 = sshll.u32 %s1414_s9, 4  ;;  %s13_s8 = int_to_ptr.hbm [resolvable:$true] %s12_s8  ;;  %s15_s10 = int_to_ptr.vmem [resolvable:$true] %s14_s10 }
   0x2   :  { %17 = dma.hbm_to_vmem [thread:$0]  %s13_s8, 64, %s15_s10, [#allocation3]  }
   0x3   :  { %1412 = dma.done.wait [#allocation3], 64  }
   0x4   :  { %1413 = vsyncadd [#allocation3], 4294967232  ;;  %v22_v0 = vld [vmem:[#allocation2] sm:$0x7]  ;;  %v1415_v30 = vmov 683565275  }
   0x5   :  { %v23_v1 = vmul.f32 2.0, %v22_v0  ;;  %v1416_v32 = vmov 2475754826   ;;  %v1417_v34 = vmov 2131351028  }
   0x6   :  { %v1418_v36 = vmov 2102212464   ;;  %v1419_v38 = vmov 920167782   ;;  %v1420_v47 = vmov 1326507024  }
   0x7   :  { %v1435_v2 = vadd.f32 -1.0, %v23_v1 }
   0x9   :  { %v1438_v3 = vmul.f32 3.1415927, %v1435_v2  ;;  %v1441_v4 = vmul.f32 6.2831855, %v1435_v2  ;;  %v1444_v5 = vmul.f32 12.566371, %v1435_v2 }
   0xb   :  { %v26_v6 = vand.u32 2147483647, %v1438_v3  ;;  %v29_v7 = vand.u32 2139095040, %v1438_v3  ;;  %v336_v8 = vand.u32 2147483647, %v1441_v4  ;;  %v339_v9 = vand.u32 2139095040, %v1441_v4 }
   0xc   :  { %v649_v13 = vand.u32 2139095040, %v1444_v5 }
   0xd   :  { %v30_v10 = vshrl.u32 %v29_v7, 23  ;;  %v33_v11 = vand.u32 8388607, %v26_v6  ;;  %v340_v12 = vshrl.u32 %v339_v9, 23  ;;  %v343_v17 = vand.u32 8388607, %v336_v8 }
   0xe   :  { %v650_v20 = vshrl.u32 %v649_v13, 23 }
   0xf   :  { %v1355_v14 = vadd.s32 4294967169, %v30_v10  ;;  %v34_v15 = vor.u32 8388608, %v33_v11  ;;  %v1361_v16 = vadd.s32 4294967169, %v340_v12  ;;  %v344_v23 = vor.u32 8388608, %v343_v17 }
  0x10   :  { %v1461_v28 = vadd.s32 4294967169, %v650_v20 }
  0x11   :  { %v36_v18 = vadd.s32 1, %v1355_v14  ;;  %v346_v19 = vadd.s32 1, %v1361_v16  ;;  %v1455_v22 = vshll.u32 %v34_v15, 8  ;;  %v1469_v41 = vshll.u32 %v344_v23, 8 }
  0x13   :  { %vm37_vm0 = vcmp.gt.s32.totalorder %v36_v18, 0  ;;  %vm347_vm1 = vcmp.gt.s32.totalorder %v346_v19, 0  ;;  %v75_v40 = vand.u32 65535, %v1455_v22  ;;  %v76_v45 = vshrl.u32 %v1455_v22, 16 }
  0x14   :  { %v38_v21 = vsel %vm37_vm0, %v36_v18, 0  ;;  %v348_v25 = vsel %vm347_vm1, %v346_v19, 0 }
  0x15   :  { %v40_v24 = vand.u32 31, %v38_v21  ;;  %v1457_v26 = vshrl.u32 %v38_v21, 5  ;;  %v1459_v27 = vand.u32 31, %v348_v25  ;;  %v1489_v58 = vshrl.u32 %v348_v25, 5 }
  0x17   :  { %v41_v29 = vsub.s32 32, %v40_v24  ;;  %v43_v31 = vshll.u32 %v1415_v30, %v40_v24  ;;  %v46_v33 = vshll.u32 %v1416_v32, %v40_v24  ;;  %v49_v35 = vshll.u32 %v1417_v34, %v40_v24 }
  0x18   :  { %v52_v37 = vshll.u32 %v1418_v36, %v40_v24  ;;  %v55_v39 = vshll.u32 %v1419_v38, %v40_v24  ;;  %vm58_vm2 = vcmp.lt.s32.totalorder %v1457_v26, 1  ;;  %vm61_vm3 = vcmp.lt.s32.totalorder %v1457_v26, 4 }
  0x19   :  { %v44_v42 = vshrl.u32 %v1416_v32, %v41_v29  ;;  %v47_v43 = vshrl.u32 %v1417_v34, %v41_v29  ;;  %v50_v44 = vshrl.u32 %v1418_v36, %v41_v29  ;;  %v53_v46 = vshrl.u32 %v1419_v38, %v41_v29 }
  0x1a   :  { %v56_v48 = vshrl.u32 %v1420_v47, %v41_v29  ;;  %v1480_v52 = vsub.s32 32, %v1459_v27  ;;  %v42_v53 = vshrl.u32 %v1415_v30, %v41_v29  ;;  %vm60_vm4 = vcmp.lt.s32.totalorder %v1457_v26, 3 }
  0x1b   :  { %v45_v49 = vor.u32 %v44_v42, %v43_v31  ;;  %v48_v50 = vor.u32 %v47_v43, %v46_v33  ;;  %v51_v51 = vor.u32 %v50_v44, %v49_v35  ;;  %v54_v54 = vor.u32 %v53_v46, %v52_v37 }
  0x1c   :  { %v57_v55 = vor.u32 %v56_v48, %v55_v39  ;;  %vm59_vm5 = vcmp.lt.s32.totalorder %v1457_v26, 2  ;;  %v353_v61 = vshll.u32 %v1415_v30, %v1459_v27  ;;  %v356_v62 = vshll.u32 %v1416_v32, %v1459_v27 }
  0x1d   :  { %v66_v56 = vsel %vm58_vm2, %v45_v49, %v48_v50  ;;  %v70_v57 = vsel %vm58_vm2, %v48_v50, %v51_v51  ;;  %v67_v59 = vsel %vm61_vm3, %v54_v54, 920167782  ;;  %v63_v63 = vsel %vm61_vm3, %v51_v51, 2102212464 }
  0x1e   :  { %v71_v60 = vsel %vm61_vm3, %v57_v55, 1326507024  ;;  %v68_v0 = vsel %vm60_vm4, %v51_v51, %v67_v59  ;;  %v354_v7 = vshrl.u32 %v1416_v32, %v1480_v52  ;;  %v62_v9 = vsel %vm58_vm2, %v42_v53, %v45_v49 }
  0x1f   :  { %v72_v1 = vsel %vm60_vm4, %v54_v54, %v71_v60  ;;  %v69_v10 = vsel %vm59_vm5, %v66_v56, %v68_v0  ;;  %v357_v12 = vshrl.u32 %v1417_v34, %v1480_v52  ;;  %v64_v17 = vsel %vm60_vm4, %v48_v50, %v63_v63 }
  0x20   :  { %v73_v11 = vsel %vm59_vm5, %v70_v57, %v72_v1  ;;  %v99_v15 = vand.u32 65535, %v69_v10  ;;  %v100_v16 = vshrl.u32 %v69_v10, 16  ;;  %v1517_v18 = vor.u32 %v354_v7, %v353_v61 }
  0x21   :  { %v77_v13 = vand.u32 65535, %v73_v11  ;;  %v78_v14 = vshrl.u32 %v73_v11, 16  ;;  %v1519_v19 = vor.u32 %v357_v12, %v356_v62  ;;  %v359_v20 = vshll.u32 %v1417_v34, %v1459_v27 }
  0x22   :  { %v360_v25 = vshrl.u32 %v1418_v36, %v1480_v52  ;;  %v101_v31 = vmul.u32 %v99_v15, %v75_v40  ;;  %v102_v33 = vmul.u32 %v100_v16, %v75_v40  ;;  %v103_v35 = vmul.u32 %v99_v15, %v76_v45 }
  0x23   :  { %v79_v21 = vmul.u32 %v77_v13, %v75_v40  ;;  %v80_v23 = vmul.u32 %v78_v14, %v75_v40  ;;  %v81_v24 = vmul.u32 %v77_v13, %v76_v45  ;;  %v82_v29 = vmul.u32 %v78_v14, %v76_v45 }
  0x24   :  { %v104_v43 = vmul.u32 %v100_v16, %v76_v45  ;;  %v105_v46 = vshll.u32 %v102_v33, 16  ;;  %v106_v48 = vshrl.u32 %v102_v33, 16  ;;  %v107_v49 = vshll.u32 %v103_v35, 16 }
  0x25   :  { %v83_v37 = vshll.u32 %v80_v23, 16  ;;  %v84_v39 = vshrl.u32 %v80_v23, 16  ;;  %v85_v42 = vshll.u32 %v81_v24, 16  ;;  %v86_v44 = vshrl.u32 %v81_v24, 16 }
  0x26   :  { %v108_v51 = vshrl.u32 %v103_v35, 16  ;;  %v362_v53 = vshll.u32 %v1418_v36, %v1459_v27  ;;  %v1421_v54 = vmov 0   ;;  %vm109_vm7 = vc.u32 %v101_v31, %v105_v46 }
  0x27   :  { %vm87_vm6 = vc.u32 %v79_v21, %v83_v37  ;;  %v89_v50 = vadd.s32 %v83_v37, %v79_v21  ;;  %v111_v40 = vadd.s32 %v105_v46, %v101_v31  ;;  %v363_v56 = vshrl.u32 %v1419_v38, %v1480_v52 }
  0x28   :  { %v88_v55 = vsel %vm87_vm6, 1, %v1421_v54  ;;  %v110_v45 = vsel %vm109_vm7, 1, %v1421_v54  ;;  %v365_v59 = vshll.u32 %v1419_v38, %v1459_v27  ;;  %v361_v62 = vor.u32 %v360_v25, %v359_v20 }
  0x29   :  { %v90_v57 = vadd.s32 %v88_v55, %v82_v29  ;;  %vm91_vm8 = vc.u32 %v89_v50, %v85_v42  ;;  %v112_v61 = vadd.s32 %v110_v45, %v104_v43  ;;  %vm113_vm9 = vc.u32 %v111_v40, %v107_v49 }
  0x2a   :  { %v92_v60 = vsel %vm91_vm8, 1, %v1421_v54  ;;  %v114_v0 = vsel %vm113_vm9, 1, %v1421_v54  ;;  %v364_v1 = vor.u32 %v363_v56, %v362_v53  ;;  %v366_v7 = vshrl.u32 %v1420_v47, %v1480_v52 }
  0x2b   :  { %v94_v63 = vadd.s32 %v92_v60, %v90_v57  ;;  %v1537_v10 = vadd.s32 %v111_v40, %v107_v49  ;;  %v116_v11 = vadd.s32 %v114_v0, %v112_v61  ;;  %vm368_vm10 = vcmp.lt.s32.totalorder %v1489_v58, 1 }
  0x2c   :  { %vm370_vm11 = vcmp.lt.s32.totalorder %v1489_v58, 3  ;;  %v367_v12 = vor.u32 %v366_v7, %v365_v59  ;;  %vm369_vm12 = vcmp.lt.s32.totalorder %v1489_v58, 2  ;;  %vm371_vm13 = vcmp.lt.s32.totalorder %v1489_v58, 4 }
  0x2d   :  { %v95_v27 = vadd.s32 %v94_v63, %v84_v39  ;;  %v65_v13 = vsel %vm59_vm5, %v62_v9, %v64_v17  ;;  %v117_v14 = vadd.s32 %v116_v11, %v106_v48  ;;  %v376_v15 = vsel %vm368_vm10, %v1517_v18, %v1519_v19 }
  0x2e   :  { %v377_v16 = vsel %vm371_vm13, %v364_v1, 920167782  ;;  %v380_v23 = vsel %vm368_vm10, %v1519_v19, %v361_v62  ;;  %v385_v26 = vand.u32 65535, %v1469_v41  ;;  %v381_v24 = vsel %vm371_vm13, %v367_v12, 1326507024 }
  0x2f   :  { %v1551_v20 = vadd.s32 %v95_v27, %v86_v44  ;;  %v378_v21 = vsel %vm370_vm11, %v361_v62, %v377_v16  ;;  %v118_v9 = vadd.s32 %v117_v14, %v108_v51  ;;  %v386_v25 = vshrl.u32 %v1469_v41, 16 }
  0x30   :  { %v379_v17 = vsel %vm369_vm12, %v376_v15, %v378_v21  ;;  %v119_v29 = vmul.u32 %v1455_v22, %v65_v13  ;;  %v382_v31 = vsel %vm370_vm11, %v364_v1, %v381_v24  ;;  %v656_v42 = vadd.s32 1, %v1461_v28 }
  0x31   :  { %vm121_vm14 = vc.u32 %v1551_v20, %v1537_v10  ;;  %v409_v33 = vand.u32 65535, %v379_v17  ;;  %v122_v35 = vadd.s32 1, %v118_v9  ;;  %v383_v37 = vsel %vm369_vm12, %v380_v23, %v382_v31 }
  0x32   :  { %v410_v39 = vshrl.u32 %v379_v17, 16  ;;  %v352_v43 = vshrl.u32 %v1415_v30, %v1480_v52  ;;  %v387_v44 = vand.u32 65535, %v383_v37  ;;  %v388_v46 = vshrl.u32 %v383_v37, 16 }
  0x33   :  { %v123_v22 = vsel %vm121_vm14, %v122_v35, %v118_v9  ;;  %v411_v48 = vmul.u32 %v409_v33, %v385_v26  ;;  %v413_v50 = vmul.u32 %v409_v33, %v386_v25  ;;  %vm657_vm15 = vcmp.gt.s32.totalorder %v656_v42, 0 }
  0x34   :  { %v412_v49 = vmul.u32 %v410_v39, %v385_v26  ;;  %v124_v51 = vadd.s32 %v123_v22, %v119_v29  ;;  %v389_v53 = vmul.u32 %v387_v44, %v385_v26  ;;  %v390_v55 = vmul.u32 %v388_v46, %v385_v26 }
  0x35   :  { %v391_v40 = vmul.u32 %v387_v44, %v386_v25  ;;  %v373_v45 = vsel %vm371_vm13, %v361_v62, 2102212464  ;;  %v392_v28 = vmul.u32 %v388_v46, %v386_v25  ;;  %v372_v52 = vsel %vm368_vm10, %v352_v43, %v1517_v18 }
  0x36   :  { %v415_v56 = vshll.u32 %v412_v49, 16  ;;  %v125_v57 = vadd.s32 536870912, %v124_v51  ;;  %v393_v59 = vshll.u32 %v390_v55, 16  ;;  %v414_v61 = vmul.u32 %v410_v39, %v386_v25 }
  0x37   :  { %v395_v60 = vshll.u32 %v391_v40, 16  ;;  %v417_v63 = vshll.u32 %v413_v50, 16  ;;  %v374_v7 = vsel %vm370_vm11, %v1519_v19, %v373_v45  ;;  %v394_v18 = vshrl.u32 %v390_v55, 16 }
  0x38   :  { %v1579_v0 = vshrl.u32 %v125_v57, 30  ;;  %vm397_vm0 = vc.u32 %v389_v53, %v393_v59  ;;  %v399_v1 = vadd.s32 %v393_v59, %v389_v53  ;;  %vm419_vm1 = vc.u32 %v411_v48, %v415_v56 }
  0x39   :  { %v398_v62 = vsel %vm397_vm0, 1, %v1421_v54  ;;  %v420_v11 = vsel %vm419_vm1, 1, %v1421_v54  ;;  %v421_v27 = vadd.s32 %v415_v56, %v411_v48  ;;  %v416_v15 = vshrl.u32 %v412_v49, 16 }
  0x3a   :  { %v127_v12 = vshll.u32 %v1579_v0, 30  ;;  %v400_v13 = vadd.s32 %v398_v62, %v392_v28  ;;  %vm401_vm2 = vc.u32 %v399_v1, %v395_v60  ;;  %v422_v16 = vadd.s32 %v420_v11, %v414_v61 }
  0x3b   :  { %v402_v14 = vsel %vm401_vm2, 1, %v1421_v54  ;;  %vm423_vm3 = vc.u32 %v421_v27, %v417_v63  ;;  %v396_v23 = vshrl.u32 %v391_v40, 16  ;;  %v418_v9 = vshrl.u32 %v413_v50, 16 }
  0x3c   :  { %v128_v21 = vsub.s32 %v124_v51, %v127_v12  ;;  %v404_v26 = vadd.s32 %v402_v14, %v400_v13  ;;  %v424_v19 = vsel %vm423_vm3, 1, %v1421_v54  ;;  %v1589_v17 = vadd.s32 %v421_v27, %v417_v63 }
  0x3d   :  { %v426_v24 = vadd.s32 %v424_v19, %v422_v16  ;;  %v658_v31 = vsel %vm657_vm15, %v656_v42, 0  ;;  %v375_v33 = vsel %vm369_vm12, %v372_v52, %v374_v7  ;;  %v646_v50 = vand.u32 2147483647, %v1444_v5 }
  0x3e   :  { %vm129_vm4 = vcmp.lt.s32.totalorder %v128_v21, 0  ;;  %v130_v25 = vsub.s32 0, %v128_v21  ;;  %v405_v29 = vadd.s32 %v404_v26, %v394_v18  ;;  %v660_v46 = vand.u32 31, %v658_v31 }
  0x3f   :  { %v427_v35 = vadd.s32 %v426_v24, %v416_v15  ;;  %v429_v22 = vmul.u32 %v1469_v41, %v375_v33  ;;  %v120_v58 = vadd.s32 %v1537_v10, %v1551_v20  ;;  %v653_v41 = vand.u32 8388607, %v646_v50 }
  0x40   :  { %v131_v37 = vsel %vm129_vm4, %v130_v25, %v128_v21  ;;  %v1594_v39 = vadd.s32 %v405_v29, %v396_v23  ;;  %v1602_v51 = vsub.s32 32, %v660_v46  ;;  %v666_v28 = vshll.u32 %v1416_v32, %v660_v46 }
  0x41   :  { %v132_v43 = vclz %v131_v37  ;;  %v428_v44 = vadd.s32 %v427_v35, %v418_v9  ;;  %v669_v59 = vshll.u32 %v1417_v34, %v660_v46  ;;  %v1614_v63 = vshrl.u32 %v658_v31, 5 }
  0x42   :  { %vm431_vm5 = vc.u32 %v1594_v39, %v1589_v17  ;;  %v667_v10 = vshrl.u32 %v1417_v34, %v1602_v51  ;;  %v670_v20 = vshrl.u32 %v1418_v36, %v1602_v51  ;;  %v672_v1 = vshll.u32 %v1418_v36, %v660_v46 }
  0x43   :  { %v1356_v48 = vadd.s32 4294967294, %v132_v43  ;;  %v432_v49 = vadd.s32 1, %v428_v44  ;;  %v673_v7 = vshrl.u32 %v1419_v38, %v1602_v51  ;;  %v654_v27 = vor.u32 8388608, %v653_v41 }
  0x44   :  { %v675_v12 = vshll.u32 %v1419_v38, %v660_v46  ;;  %v663_v13 = vshll.u32 %v1415_v30, %v660_v46  ;;  %v664_v14 = vshrl.u32 %v1416_v32, %v1602_v51  ;;  %v676_v15 = vshrl.u32 %v1420_v47, %v1602_v51 }
  0x45   :  { %vm1357_vm6 = vcmp.lt.s32.totalorder %v1356_v48, 0  ;;  %v433_v42 = vsel %vm431_vm5, %v432_v49, %v428_v44  ;;  %v1626_v23 = vor.u32 %v667_v10, %v666_v28  ;;  %v1628_v26 = vor.u32 %v670_v20, %v669_v59 }
  0x46   :  { %v135_v53 = vsel %vm1357_vm6, 0, %v1356_v48  ;;  %v434_v55 = vadd.s32 %v433_v42, %v429_v22  ;;  %v674_v9 = vor.u32 %v673_v7, %v672_v1  ;;  %v677_v24 = vor.u32 %v676_v15, %v675_v12 }
  0x47   :  { %v136_v40 = vsub.s32 32, %v135_v53  ;;  %v137_v56 = vshll.u32 %v128_v21, %v135_v53  ;;  %v140_v57 = vsub.s32 4294967266, %v135_v53  ;;  %vm678_vm7 = vcmp.lt.s32.totalorder %v1614_v63, 1 }
  0x48   :  { %v435_v45 = vadd.s32 536870912, %v434_v55  ;;  %vm681_vm8 = vcmp.lt.s32.totalorder %v1614_v63, 4  ;;  %v1632_v29 = vshll.u32 %v654_v27, 8  ;;  %v1634_v33 = vor.u32 %v664_v14, %v663_v13 }
  0x49   :  { %v138_v52 = vshrl.u32 %v120_v58, %v136_v40  ;;  %v141_v60 = vadd.s32 127, %v140_v57  ;;  %vm680_vm10 = vcmp.lt.s32.totalorder %v1614_v63, 3  ;;  %vm28_vm11 = vcmp.lt.s32.totalorder %v1438_v3, 0 }
  0x4a   :  { %v1612_v61 = vshrl.u32 %v435_v45, 30  ;;  %vm679_vm12 = vcmp.lt.s32.totalorder %v1614_v63, 2  ;;  %v690_v37 = vsel %vm678_vm7, %v1626_v23, %v1628_v26  ;;  %vm1645_vm13 = vcmp.le.f32.partialorder %v26_v6, 0.7853982 }
  0x4b   :  { %v139_v62 = vor.u32 %v138_v52, %v137_v56  ;;  %v142_v11 = vshll.u32 %v141_v60, 23  ;;  %v687_v46 = vsel %vm681_vm8, %v674_v9, 920167782  ;;  %v691_v22 = vsel %vm681_vm8, %v677_v24, 1326507024 }
  0x4c   :  { %v437_v18 = vshll.u32 %v1612_v61, 30  ;;  %v150_v49 = vsub.s32 4, %v1579_v0  ;;  %v692_v42 = vsel %vm680_vm10, %v674_v9, %v691_v22  ;;  %v686_v6 = vsel %vm678_vm7, %v1634_v33, %v1626_v23 }
  0x4d   :  { %v143_v16 = vor.u32 4788187, %v142_v11  ;;  %v146_v21 = vcvt.s32.f32 %v139_v62  ;;  %v693_v53 = vsel %vm679_vm12, %v690_v37, %v692_v42  ;;  %v688_v57 = vsel %vm680_vm10, %v1628_v26, %v687_v46 }
  0x4e   :  { %v438_v19 = vsub.s32 %v434_v55, %v437_v18  ;;  %v695_v55 = vand.u32 65535, %v1632_v29  ;;  %v698_v41 = vshrl.u32 %v693_v53, 16  ;;  %v697_v28 = vand.u32 65535, %v693_v53 }
  0x4f   :  { %v144_v25 = vand.u32 2147483647, %v143_v16  ;;  %v151_v59 = vsel %vm28_vm11, %v150_v49, %v1579_v0  ;;  %v430_v60 = vadd.s32 %v1589_v17, %v1594_v39  ;;  %v689_v20 = vsel %vm679_vm12, %v686_v6, %v688_v57 }
  0x50   :  { %vm439_vm9 = vcmp.lt.s32.totalorder %v438_v19, 0  ;;  %v440_v31 = vsub.s32 0, %v438_v19  ;;  %v696_v1 = vshrl.u32 %v1632_v29, 16  ;;  %v1683_v7 = vmul.u32 %v698_v41, %v695_v55 }
  0x51   :  { %v147_v35 = vmul.f32 %v146_v21, %v144_v25  ;;  %v153_v0 = vsel %vm1645_vm13, 0, %v151_v59  ;;  %v699_v13 = vmul.u32 %v697_v28, %v695_v55  ;;  %v720_v16 = vshrl.u32 %v689_v20, 16 }
  0x52   :  { %v441_v44 = vsel %vm439_vm9, %v440_v31, %v438_v19  ;;  %v703_v17 = vshll.u32 %v1683_v7, 16  ;;  %vm338_vm15 = vcmp.lt.s32.totalorder %v1441_v4, 0  ;;  %v1689_v9 = vmul.u32 %v697_v28, %v696_v1 }
  0x53   :  { %v148_v48 = vxor.u32 2147483648, %v147_v35  ;;  %v442_v58 = vclz %v441_v44  ;;  %v719_v24 = vand.u32 65535, %v689_v20  ;;  %v170_v37 = vadd.s32 3, %v153_v0 }
  0x54   :  { %vm1695_vm0 = vcmp.le.f32.partialorder %v336_v8, 0.7853982  ;;  %v702_v46 = vmul.u32 %v698_v41, %v696_v1  ;;  %vm707_vm1 = vc.u32 %v699_v13, %v703_v17  ;;  %v1699_v49 = vand.u32 3, %v153_v0 }
  0x55   :  { %v149_v40 = vsel %vm28_vm11, %v148_v48, %v147_v35  ;;  %v1362_v56 = vadd.s32 4294967294, %v442_v58  ;;  %v662_v35 = vshrl.u32 %v1415_v30, %v1602_v51  ;;  %v722_v58 = vmul.u32 %v720_v16, %v695_v55 }
  0x56   :  { %v1671_v45 = vsel %vm1645_vm13, %v1438_v3, %v149_v40  ;;  %v705_v53 = vshll.u32 %v1689_v9, 16  ;;  %v1702_v51 = vmul.u32 %v719_v24, %v696_v1  ;;  %v460_v8 = vsub.s32 4, %v1612_v61 }
  0x57   :  { %v154_v52 = vmul.f32 %v1671_v45, %v1671_v45  ;;  %vm1363_vm14 = vcmp.lt.s32.totalorder %v1362_v56, 0  ;;  %v721_v57 = vmul.u32 %v719_v24, %v695_v55  ;;  %v1706_v28 = vand.u32 3, %v170_v37 }
  0x58   :  { %v445_v10 = vsel %vm1363_vm14, 0, %v1362_v56  ;;  %v708_v56 = vsel %vm707_vm1, 1, %v1421_v54  ;;  %v709_v59 = vadd.s32 %v703_v17, %v699_v13  ;;  %vm327_vm2 = vcmp.eq.s32.totalorder %v1699_v49, 0 }
  0x59   :  { %v155_v62 = vmul.f32 -0.001358992, %v154_v52  ;;  %v162_v11 = vmul.f32 -0.00019511016, %v154_v52  ;;  %v446_v27 = vsub.s32 32, %v445_v10  ;;  %v447_v12 = vshll.u32 %v438_v19, %v445_v10 }
  0x5a   :  { %v450_v18 = vsub.s32 4294967266, %v445_v10  ;;  %vm711_vm3 = vc.u32 %v709_v59, %v705_v53  ;;  %v727_v0 = vshll.u32 %v1702_v51, 16  ;;  %vm330_vm4 = vcmp.eq.s32.totalorder %v1699_v49, 2 }
  0x5b   :  { %v156_v39 = vadd.f32 0.041655596, %v155_v62  ;;  %v163_v14 = vadd.f32 0.008332121, %v162_v11  ;;  %v448_v15 = vshrl.u32 %v430_v60, %v446_v27  ;;  %v710_v60 = vadd.s32 %v708_v56, %v702_v46 }
  0x5c   :  { %v451_v21 = vadd.s32 127, %v450_v18  ;;  %v724_v62 = vmul.u32 %v720_v16, %v696_v1  ;;  %v725_v11 = vshll.u32 %v722_v58, 16  ;;  %v461_v55 = vsel %vm338_vm15, %v460_v8, %v1612_v61 }
  0x5d   :  { %v157_v25 = vmul.f32 %v156_v39, %v154_v52  ;;  %v164_v31 = vmul.f32 %v163_v14, %v154_v52  ;;  %v449_v19 = vor.u32 %v448_v15, %v447_v12  ;;  %v704_v12 = vshrl.u32 %v1683_v7, 16 }
  0x5e   :  { %v452_v44 = vshll.u32 %v451_v21, 23  ;;  %v712_v18 = vsel %vm711_vm3, 1, %v1421_v54  ;;  %vm729_vm5 = vc.u32 %v721_v57, %v725_v11  ;;  %v731_v17 = vadd.s32 %v725_v11, %v721_v57 }
  0x5f   :  { %v158_v22 = vadd.f32 -0.4999988, %v157_v25  ;;  %v165_v48 = vadd.f32 -0.16666654, %v164_v31  ;;  %v456_v6 = vcvt.s32.f32 %v449_v19  ;;  %v714_v1 = vadd.s32 %v712_v18, %v710_v60 }
  0x60   :  { %v453_v42 = vor.u32 4788187, %v452_v44  ;;  %v730_v13 = vsel %vm729_vm5, 1, %v1421_v54  ;;  %vm173_vm6 = vcmp.eq.s32.totalorder %v1706_v28, 0  ;;  %v683_v14 = vsel %vm681_vm8, %v1628_v26, 2102212464 }
  0x61   :  { %v166_v40 = vmul.f32 %v165_v48, %v154_v52  ;;  %v159_v10 = vmul.f32 %v158_v22, %v154_v52  ;;  %v732_v15 = vadd.s32 %v730_v13, %v724_v62  ;;  %v706_v16 = vshrl.u32 %v1689_v9, 16 }
  0x62   :  { %v454_v41 = vand.u32 2147483647, %v453_v42  ;;  %v715_v21 = vadd.s32 %v714_v1, %v704_v12  ;;  %vm733_vm9 = vc.u32 %v731_v17, %v727_v0  ;;  %v726_v25 = vshrl.u32 %v722_v58, 16 }
  0x63   :  { %v167_v20 = vadd.f32 1.0, %v166_v40  ;;  %v160_v39 = vadd.f32 1.0, %v159_v10  ;;  %v1730_v31 = vmul.f32 25.132742, %v1435_v2  ;;  %vm169_vm8 = vweird.f32 %v1438_v3 }
  0x64   :  { %v457_v27 = vmul.f32 %v456_v6, %v454_v41  ;;  %v1735_v26 = vsel %vm1695_vm0, 0, %v461_v55  ;;  %v682_v9 = vsel %vm678_vm7, %v662_v35, %v1634_v33  ;;  %v684_v37 = vsel %vm680_vm10, %v1626_v23, %v683_v14 }
  0x65   :  { %v168_v7 = vmul.f32 %v167_v20, %v1671_v45  ;;  %v734_v45 = vsel %vm733_vm9, 1, %v1421_v54  ;;  %v177_v46 = vxor.u32 2147483648, %v160_v39  ;;  %v728_v2 = vshrl.u32 %v1702_v51, 16 }
  0x66   :  { %v458_v52 = vxor.u32 2147483648, %v457_v27  ;;  %v736_v22 = vadd.s32 %v734_v45, %v732_v15  ;;  %v1744_v42 = vadd.s32 %v715_v21, %v706_v16  ;;  %v1746_v43 = vadd.s32 %v731_v17, %v727_v0 }
  0x67   :  { %v174_v44 = vxor.u32 2147483648, %v168_v7  ;;  %vm176_vm11 = vcmp.eq.s32.totalorder %v1706_v28, 2  ;;  %v685_v33 = vsel %vm679_vm12, %v682_v9, %v684_v37  ;;  %v959_v6 = vand.u32 2139095040, %v1730_v31 }
  0x68   :  { %v459_v61 = vsel %vm338_vm15, %v458_v52, %v457_v27  ;;  %v737_v35 = vadd.s32 %v736_v22, %v726_v25  ;;  %vm326_vm7 = vcmp.lt.s32.totalorder %v1699_v49, 2  ;;  %v480_v51 = vadd.s32 3, %v1735_v26 }
  0x69   :  { %v462_v24 = vsel %vm1695_vm0, %v1441_v4, %v459_v61  ;;  %v329_v40 = vsel %vm327_vm2, %v160_v39, %v174_v44  ;;  %v332_v8 = vsel %vm330_vm4, %v177_v46, %v168_v7  ;;  %v960_v57 = vshrl.u32 %v959_v6, 23 }
  0x6a   :  { %v464_v19 = vmul.f32 %v462_v24, %v462_v24  ;;  %v738_v56 = vadd.s32 %v737_v35, %v728_v2  ;;  %v739_v59 = vmul.u32 %v1632_v29, %v685_v33  ;;  %vm741_vm10 = vc.u32 %v1744_v42, %v1746_v43 }
  0x6b   :  { %vm172_vm12 = vcmp.lt.s32.totalorder %v1706_v28, 2  ;;  %v178_v60 = vsel %vm176_vm11, %v177_v46, %v168_v7  ;;  %v1373_v20 = vadd.s32 4294967169, %v960_v57  ;;  %v175_v62 = vsel %vm173_vm6, %v160_v39, %v174_v44 }
  0x6c   :  { %v465_v48 = vmul.f32 -0.001358992, %v464_v19  ;;  %v472_v58 = vmul.f32 -0.00019511016, %v464_v19  ;;  %v742_v10 = vadd.s32 1, %v738_v56  ;;  %v333_v11 = vsel %vm326_vm7, %v329_v40, %v332_v8 }
  0x6d   :  { %v481_v0 = vand.u32 3, %v480_v51  ;;  %v966_v55 = vadd.s32 1, %v1373_v20  ;;  %v179_v13 = vsel %vm172_vm12, %v175_v62, %v178_v60  ;;  %v334_v17 = vsel %vm169_vm8, nan, %v333_v11 }
  0x6e   :  { %v466_v23 = vadd.f32 0.041655596, %v465_v48  ;;  %v473_v53 = vadd.f32 0.008332121, %v472_v58  ;;  %v743_v29 = vsel %vm741_vm10, %v742_v10, %v738_v56  ;;  %v956_v49 = vand.u32 2147483647, %v1730_v31 }
  0x6f   :  { %v744_v1 = vadd.s32 %v743_v29, %v739_v59  ;;  %vm967_vm13 = vcmp.gt.s32.totalorder %v966_v55, 0  ;;  %vm486_vm14 = vcmp.eq.s32.totalorder %v481_v0, 2  ;;  %v1266_v21 = vrot.slane %v334_v17, 5 }
  0x70   :  { %v467_v41 = vmul.f32 %v466_v23, %v464_v19  ;;  %v474_v63 = vmul.f32 %v473_v53, %v464_v19  ;;  %v968_v14 = vsel %vm967_vm13, %v966_v55, 0  ;;  %v180_v45 = vsel %vm169_vm8, nan, %v179_v13 }
  0x71   :  { %v745_v39 = vadd.s32 536870912, %v744_v1  ;;  %v970_v15 = vand.u32 31, %v968_v14  ;;  %vm483_vm15 = vcmp.eq.s32.totalorder %v481_v0, 0  ;;  %vm1286_vm0 = vcmask 1042432  }
  0x72   :  { %v468_v27 = vadd.f32 -0.4999988, %v467_v41  ;;  %v475_v12 = vadd.f32 -0.16666654, %v474_v63  ;;  %vm482_vm1 = vcmp.lt.s32.totalorder %v481_v0, 2  ;;  %vm479_vm2 = vweird.f32 %v1441_v4 }
  0x73   :  { %v1776_v25 = vshrl.u32 %v745_v39, 30  ;;  %vm1288_vm3 = vcmask 1045504   ;;  %v1287_v44 = vsel %vm1286_vm0, %v180_v45, %v1266_v21  ;;  %v963_v2 = vand.u32 8388607, %v956_v49 }
  0x74   :  { %v469_v18 = vmul.f32 %v468_v27, %v464_v19  ;;  %v476_v52 = vmul.f32 %v475_v12, %v464_v19  ;;  %v1780_v19 = vsub.s32 32, %v970_v15  ;;  %v973_v48 = vshll.u32 %v1415_v30, %v970_v15 }
  0x75   :  { %v747_v37 = vshll.u32 %v1776_v25, 30  ;;  %v976_v33 = vshll.u32 %v1416_v32, %v970_v15  ;;  %v1804_v51 = vshrl.u32 %v968_v14, 5  ;;  %v979_v40 = vshll.u32 %v1417_v34, %v970_v15 }
  0x76   :  { %v1770_v7 = vadd.f32 1.0, %v469_v18  ;;  %v477_v28 = vadd.f32 1.0, %v476_v52  ;;  %v974_v58 = vshrl.u32 %v1416_v32, %v1780_v19  ;;  %v977_v23 = vshrl.u32 %v1417_v34, %v1780_v19 }
  0x77   :  { %v748_v46 = vsub.s32 %v744_v1, %v747_v37  ;;  %v980_v8 = vshrl.u32 %v1418_v36, %v1780_v19  ;;  %v982_v32 = vshll.u32 %v1418_v36, %v970_v15  ;;  %v983_v57 = vshrl.u32 %v1419_v38, %v1780_v19 }
  0x78   :  { %v1773_v61 = vmul.f32 %v477_v28, %v462_v24  ;;  %v487_v16 = vxor.u32 2147483648, %v1770_v7  ;;  %v964_v59 = vor.u32 8388608, %v963_v2  ;;  %v975_v60 = vor.u32 %v974_v58, %v973_v48 }
  0x79   :  { %vm749_vm4 = vcmp.lt.s32.totalorder %v748_v46, 0  ;;  %v750_v6 = vsub.s32 0, %v748_v46  ;;  %v978_v10 = vor.u32 %v977_v23, %v976_v33  ;;  %v984_v20 = vor.u32 %v983_v57, %v982_v32 }
  0x7a   :  { %v484_v9 = vxor.u32 2147483648, %v1773_v61  ;;  %v488_v24 = vsel %vm486_vm14, %v487_v16, %v1773_v61  ;;  %v985_v34 = vshll.u32 %v1419_v38, %v970_v15  ;;  %v986_v62 = vshrl.u32 %v1420_v47, %v1780_v19 }
  0x7b   :  { %v751_v56 = vsel %vm749_vm4, %v750_v6, %v748_v46  ;;  %v981_v36 = vor.u32 %v980_v8, %v979_v40  ;;  %vm988_vm5 = vcmp.lt.s32.totalorder %v1804_v51, 1  ;;  %vm991_vm6 = vcmp.lt.s32.totalorder %v1804_v51, 4 }
  0x7c   :  { %v485_v3 = vsel %vm483_vm15, %v1770_v7, %v484_v9  ;;  %v752_v63 = vclz %v751_v56  ;;  %vm990_vm9 = vcmp.lt.s32.totalorder %v1804_v51, 3  ;;  %v997_v27 = vsel %vm991_vm6, %v984_v20, 920167782 }
  0x7d   :  { %v489_v22 = vsel %vm482_vm1, %v485_v3, %v488_v24  ;;  %v740_v12 = vadd.s32 %v1746_v43, %v1744_v42  ;;  %v1825_v0 = vshll.u32 %v964_v59, 8  ;;  %v987_v29 = vor.u32 %v986_v62, %v985_v34 }
  0x7e   :  { %v1799_v35 = vsel %vm479_vm2, nan, %v489_v22  ;;  %v1368_v11 = vadd.s32 4294967294, %v752_v63  ;;  %vm989_vm11 = vcmp.lt.s32.totalorder %v1804_v51, 2  ;;  %v996_v47 = vsel %vm988_vm5, %v975_v60, %v978_v10 }
  0x7f   :  { %v1269_v53 = vrot.slane %v1799_v35, 2  ;;  %v998_v1 = vsel %vm990_vm9, %v981_v36, %v997_v27  ;;  %vm648_vm7 = vcmp.lt.s32.totalorder %v1444_v5, 0  ;;  %v1005_v43 = vand.u32 65535, %v1825_v0 }
  0x80   :  { %vm1369_vm8 = vcmp.lt.s32.totalorder %v1368_v11, 0  ;;  %v999_v17 = vsel %vm989_vm11, %v996_v47, %v998_v1  ;;  %v1000_v28 = vsel %vm988_vm5, %v978_v10, %v981_v36  ;;  %v1001_v39 = vsel %vm991_vm6, %v987_v29, 1326507024 }
  0x81   :  { %v1289_v41 = vsel %vm1288_vm3, %v1287_v44, %v1269_v53  ;;  %v755_v38 = vsel %vm1369_vm8, 0, %v1368_v11  ;;  %v1006_v14 = vshrl.u32 %v1825_v0, 16  ;;  %v1002_v45 = vsel %vm990_vm9, %v984_v20, %v1001_v39 }
  0x82   :  { %1300 = vxpose.xlu0.b32.start [1/3] (short) %v1289_v41, 128  ;;  %v756_v55 = vsub.s32 32, %v755_v38  ;;  %v757_v18 = vshll.u32 %v748_v46, %v755_v38  ;;  %v760_v52 = vsub.s32 4294967266, %v755_v38  ;;  %v1029_v24 = vand.u32 65535, %v999_v17 }
  0x83   :  { %v1844_v37 = vand.u32 3, %v1735_v26  ;;  %v770_v3 = vsub.s32 4, %v1776_v25  ;;  %v1003_v44 = vsel %vm989_vm11, %v1000_v28, %v1002_v45  ;;  %v1030_v46 = vshrl.u32 %v999_v17, 16 }
  0x84   :  { %v758_v13 = vshrl.u32 %v740_v12, %v756_v55  ;;  %v761_v42 = vadd.s32 127, %v760_v52  ;;  %v972_v48 = vshrl.u32 %v1415_v30, %v1780_v19  ;;  %v1007_v58 = vand.u32 65535, %v1003_v44 }
  0x85   :  { %vm1853_vm10 = vcmp.le.f32.partialorder %v646_v50, 0.7853982  ;;  %v993_v26 = vsel %vm991_vm6, %v981_v36, 2102212464  ;;  %v1008_v6 = vshrl.u32 %v1003_v44, 16  ;;  %v1032_v23 = vmul.u32 %v1030_v46, %v1005_v43 }
  0x86   :  { %v759_v15 = vor.u32 %v758_v13, %v757_v18  ;;  %v762_v21 = vshll.u32 %v761_v42, 23  ;;  %v1011_v8 = vmul.u32 %v1007_v58, %v1006_v14  ;;  %v1031_v56 = vmul.u32 %v1029_v24, %v1005_v43 }
  0x87   :  { %v1033_v32 = vmul.u32 %v1029_v24, %v1006_v14  ;;  %v771_v30 = vsel %vm648_vm7, %v770_v3, %v1776_v25  ;;  %v1009_v19 = vmul.u32 %v1007_v58, %v1005_v43  ;;  %v1010_v57 = vmul.u32 %v1008_v6, %v1005_v43 }
  0x88   :  { %v763_v2 = vor.u32 4788187, %v762_v21  ;;  %v766_v22 = vcvt.s32.f32 %v759_v15  ;;  %v1035_v41 = vshll.u32 %v1032_v23, 16  ;;  %vm637_vm12 = vcmp.eq.s32.totalorder %v1844_v37, 0 }
  0x89   :  { %v992_v63 = vsel %vm988_vm5, %v972_v48, %v975_v60  ;;  %v994_v59 = vsel %vm990_vm9, %v978_v10, %v993_v26  ;;  %v1034_v20 = vmul.u32 %v1030_v46, %v1006_v14  ;;  %v1012_v34 = vmul.u32 %v1008_v6, %v1006_v14 }
  0x8a   :  { %v764_v40 = vand.u32 2147483647, %v763_v2  ;;  %v1013_v62 = vshll.u32 %v1010_v57, 16  ;;  %v1015_v11 = vshll.u32 %v1011_v8, 16  ;;  %v1037_v36 = vshll.u32 %v1033_v32, 16 }
  0x8b   :  { %v1036_v12 = vshrl.u32 %v1032_v23, 16  ;;  %vm1039_vm13 = vc.u32 %v1031_v56, %v1035_v41  ;;  %v1041_v25 = vadd.s32 %v1035_v41, %v1031_v56  ;;  %v1014_v38 = vshrl.u32 %v1010_v57, 16 }
  0x8c   :  { %v767_v50 = vmul.f32 %v766_v22, %v764_v40  ;;  %vm1017_vm14 = vc.u32 %v1009_v19, %v1013_v62  ;;  %v1019_v29 = vadd.s32 %v1013_v62, %v1009_v19  ;;  %v1040_v47 = vsel %vm1039_vm13, 1, %v1421_v54 }
  0x8d   :  { %v1018_v55 = vsel %vm1017_vm14, 1, %v1421_v54  ;;  %v1042_v10 = vadd.s32 %v1040_v47, %v1034_v20  ;;  %vm1043_vm15 = vc.u32 %v1041_v25, %v1037_v36  ;;  %v1038_v43 = vshrl.u32 %v1033_v32, 16 }
  0x8e   :  { %v768_v27 = vxor.u32 2147483648, %v767_v50  ;;  %v1020_v52 = vadd.s32 %v1018_v55, %v1012_v34  ;;  %vm1021_vm0 = vc.u32 %v1019_v29, %v1015_v11  ;;  %v1044_v1 = vsel %vm1043_vm15, 1, %v1421_v54 }
  0x8f   :  { %v1022_v42 = vsel %vm1021_vm0, 1, %v1421_v54  ;;  %v1046_v17 = vadd.s32 %v1044_v1, %v1042_v10  ;;  %vm640_vm1 = vcmp.eq.s32.totalorder %v1844_v37, 2  ;;  %v773_v28 = vsel %vm1853_vm10, 0, %v771_v30 }
  0x90   :  { %v769_v60 = vsel %vm648_vm7, %v768_v27, %v767_v50  ;;  %v1016_v39 = vshrl.u32 %v1011_v8, 16  ;;  %v1024_v14 = vadd.s32 %v1022_v42, %v1020_v52  ;;  %v995_v45 = vsel %vm989_vm11, %v992_v63, %v994_v59 }
  0x91   :  { %v772_v18 = vsel %vm1853_vm10, %v1444_v5, %v769_v60  ;;  %v1047_v24 = vadd.s32 %v1046_v17, %v1036_v12  ;;  %vm636_vm3 = vcmp.lt.s32.totalorder %v1844_v37, 2  ;;  %v1045_v44 = vadd.s32 %v1041_v25, %v1037_v36 }
  0x92   :  { %v774_v13 = vmul.f32 %v772_v18, %v772_v18  ;;  %v1025_v3 = vadd.s32 %v1024_v14, %v1014_v38  ;;  %v642_v54 = vsel %vm640_vm1, %v487_v16, %v1773_v61  ;;  %v639_v48 = vsel %vm637_vm12, %v1770_v7, %v484_v9 }
  0x93   :  { %v1048_v22 = vadd.s32 %v1047_v24, %v1038_v43  ;;  %v790_v51 = vadd.s32 3, %v773_v28  ;;  %v1049_v33 = vmul.u32 %v1825_v0, %v995_v45  ;;  %v643_v40 = vsel %vm636_vm3, %v639_v48, %v642_v54 }
  0x94   :  { %v775_v15 = vmul.f32 -0.001358992, %v774_v13  ;;  %v782_v21 = vmul.f32 -0.00019511016, %v774_v13  ;;  %v1026_v58 = vadd.s32 %v1025_v3, %v1016_v39  ;;  %v945_v30 = vand.u32 3, %v773_v28 }
  0x95   :  { %v1052_v23 = vadd.s32 1, %v1048_v22  ;;  %v791_v32 = vand.u32 3, %v790_v51  ;;  %v644_v7 = vsel %vm479_vm2, nan, %v643_v40  ;;  %vm789_vm10 = vweird.f32 %v1444_v5 }
  0x96   :  { %v776_v46 = vadd.f32 0.041655596, %v775_v15  ;;  %v783_v2 = vadd.f32 0.008332121, %v782_v21  ;;  %vm1051_vm4 = vc.u32 %v1026_v58, %v1045_v44  ;;  %vm950_vm6 = vcmp.eq.s32.totalorder %v945_v30, 2 }
  0x97   :  { %v1053_v56 = vsel %vm1051_vm4, %v1052_v23, %v1048_v22  ;;  %vm796_vm5 = vcmp.eq.s32.totalorder %v791_v32, 2  ;;  %v1272_v50 = vrot.slane %v644_v7, 7  ;;  %vm792_vm9 = vcmp.lt.s32.totalorder %v791_v32, 2 }
  0x98   :  { %v777_v26 = vmul.f32 %v776_v46, %v774_v13  ;;  %v784_v6 = vmul.f32 %v783_v2, %v774_v13  ;;  %v1054_v19 = vadd.s32 %v1053_v56, %v1049_v33  ;;  %vm793_vm8 = vcmp.eq.s32.totalorder %v791_v32, 0 }
  0x99   :  { %vm947_vm11 = vcmp.eq.s32.totalorder %v945_v30, 0  ;;  %vm946_vm7 = vcmp.lt.s32.totalorder %v945_v30, 2  ;;  %vm1290_vm2 = vcmask 1040384   ;;  %vm1292_vm13 = vcmask 1043456  }
  0x9a   :  { %v778_v8 = vadd.f32 -0.4999988, %v777_v26  ;;  %v785_v16 = vadd.f32 -0.16666654, %v784_v6  ;;  %v1055_v9 = vadd.s32 536870912, %v1054_v19  ;;  %v1291_v60 = vsel %vm1290_vm2, %v1269_v53, %v1272_v50 }
  0x9b   :  { %vm1294_vm14 = vcmask 1046528   ;;  %v1050_v42 = vadd.s32 %v1045_v44, %v1026_v58  ;;  %vm958_vm0 = vcmp.lt.s32.totalorder %v1730_v31, 0  ;;  %vm957_vm1 = vcmp.le.f32.partialorder %v956_v49, 0.7853982 }
  0x9c   :  { %v779_v61 = vmul.f32 %v778_v8, %v774_v13  ;;  %v786_v57 = vmul.f32 %v785_v16, %v774_v13  ;;  %v1056_v0 = vshrl.u32 %v1055_v9, 30  ;;  %vm1332_vm2 = vcmask 195584  }
  0x9e   :  { %v780_v37 = vadd.f32 1.0, %v779_v61  ;;  %v787_v41 = vadd.f32 1.0, %v786_v57  ;;  %v1057_v20 = vshll.u32 %v1056_v0, 30  ;;  %v1080_v54 = vsub.s32 4, %v1056_v0 }
  0xa0   :  { %v788_v63 = vmul.f32 %v787_v41, %v772_v18  ;;  %v797_v59 = vxor.u32 2147483648, %v780_v37  ;;  %v1058_v4 = vsub.s32 %v1054_v19, %v1057_v20  ;;  %v1081_v2 = vsel %vm958_vm0, %v1080_v54, %v1056_v0 }
  0xa1   :  { %v1083_v51 = vsel %vm957_vm1, 0, %v1081_v2 }
  0xa2   :  { %v794_v34 = vxor.u32 2147483648, %v788_v63  ;;  %v798_v62 = vsel %vm796_vm5, %v797_v59, %v788_v63  ;;  %v952_v11 = vsel %vm950_vm6, %v797_v59, %v788_v63  ;;  %vm1059_vm12 = vcmp.lt.s32.totalorder %v1058_v4, 0 }
  0xa3   :  { %v1060_v38 = vsub.s32 0, %v1058_v4  ;;  %v1100_v23 = vadd.s32 3, %v1083_v51  ;;  %v1255_v30 = vand.u32 3, %v1083_v51 }
  0xa4   :  { %v795_v36 = vsel %vm793_vm8, %v780_v37, %v794_v34  ;;  %v949_v27 = vsel %vm947_vm11, %v780_v37, %v794_v34  ;;  %vm1099_vm11 = vweird.f32 %v1730_v31 }
  0xa5   :  { %v799_v12 = vsel %vm792_vm9, %v795_v36, %v798_v62  ;;  %v953_v25 = vsel %vm946_vm7, %v949_v27, %v952_v11  ;;  %v1061_v5 = vsel %vm1059_vm12, %v1060_v38, %v1058_v4  ;;  %v1101_v32 = vand.u32 3, %v1100_v23 }
  0xa6   :  { %v800_v29 = vsel %vm789_vm10, nan, %v799_v12  ;;  %v1894_v47 = vsel %vm789_vm10, nan, %v953_v25  ;;  %v1062_v18 = vclz %v1061_v5  ;;  %vm1260_vm4 = vcmp.eq.s32.totalorder %v1255_v30, 2 }
  0xa7   :  { %v1275_v55 = vrot.slane %v800_v29, 4  ;;  %v1278_v10 = vrot.slane %v1894_v47, 1  ;;  %vm1106_vm3 = vcmp.eq.s32.totalorder %v1101_v32, 2  ;;  %vm1102_vm5 = vcmp.lt.s32.totalorder %v1101_v32, 2 }
  0xa8   :  { %v1374_v13 = vadd.s32 4294967294, %v1062_v18  ;;  %vm1103_vm6 = vcmp.eq.s32.totalorder %v1101_v32, 0  ;;  %vm1257_vm9 = vcmp.eq.s32.totalorder %v1255_v30, 0  ;;  %vm1256_vm8 = vcmp.lt.s32.totalorder %v1255_v30, 2 }
  0xa9   :  { %v1293_v52 = vsel %vm1292_vm13, %v1291_v60, %v1275_v55  ;;  %vm1296_vm7 = vcmask 1041408   ;;  %vm1298_vm10 = vcmask 1044480  }
  0xaa   :  { %v1295_v1 = vsel %vm1294_vm14, %v1293_v52, %v1278_v10  ;;  %vm1375_vm15 = vcmp.lt.s32.totalorder %v1374_v13, 0 }
  0xab   :  { %1301 = vxpose.xlu0.b32.cont [2/3] (short) %v1295_v1, 128  ;;  %v1065_v43 = vsel %vm1375_vm15, 0, %v1374_v13 }
  0xac   :  { %v1066_v17 = vsub.s32 32, %v1065_v43  ;;  %v1067_v28 = vshll.u32 %v1058_v4, %v1065_v43  ;;  %v1070_v35 = vsub.s32 4294967266, %v1065_v43 }
  0xae   :  { %v1068_v53 = vshrl.u32 %v1050_v42, %v1066_v17  ;;  %v1071_v39 = vadd.s32 127, %v1070_v35 }
  0xb0   :  { %v1069_v14 = vor.u32 %v1068_v53, %v1067_v28  ;;  %v1072_v15 = vshll.u32 %v1071_v39, 23 }
  0xb2   :  { %v1073_v21 = vor.u32 4788187, %v1072_v15  ;;  %v1076_v45 = vcvt.s32.f32 %v1069_v14 }
  0xb4   :  { %v1074_v24 = vand.u32 2147483647, %v1073_v21 }
  0xb6   :  { %v1077_v3 = vmul.f32 %v1076_v45, %v1074_v24 }
  0xb8   :  { %v1078_v44 = vxor.u32 2147483648, %v1077_v3 }
  0xba   :  { %v1079_v46 = vsel %vm958_vm0, %v1078_v44, %v1077_v3 }
  0xbb   :  { %v1082_v22 = vsel %vm957_vm1, %v1730_v31, %v1079_v46 }
  0xbc   :  { %v1084_v48 = vmul.f32 %v1082_v22, %v1082_v22 }
  0xbe   :  { %v1085_v58 = vmul.f32 -0.001358992, %v1084_v48  ;;  %v1092_v33 = vmul.f32 -0.00019511016, %v1084_v48 }
  0xc0   :  { %v1086_v26 = vadd.f32 0.041655596, %v1085_v58  ;;  %v1093_v6 = vadd.f32 0.008332121, %v1092_v33 }
  0xc2   :  { %v1087_v40 = vmul.f32 %v1086_v26, %v1084_v48  ;;  %v1094_v8 = vmul.f32 %v1093_v6, %v1084_v48 }
  0xc4   :  { %v1088_v16 = vadd.f32 -0.4999988, %v1087_v40  ;;  %v1095_v56 = vadd.f32 -0.16666654, %v1094_v8 }
  0xc6   :  { %v1089_v19 = vmul.f32 %v1088_v16, %v1084_v48  ;;  %v1096_v49 = vmul.f32 %v1095_v56, %v1084_v48 }
  0xc8   :  { %v1090_v61 = vadd.f32 1.0, %v1089_v19  ;;  %v1097_v57 = vadd.f32 1.0, %v1096_v49 }
  0xca   :  { %v1098_v7 = vmul.f32 %v1097_v57, %v1082_v22  ;;  %v1107_v9 = vxor.u32 2147483648, %v1090_v61 }
  0xcc   :  { %v1104_v37 = vxor.u32 2147483648, %v1098_v7  ;;  %v1108_v41 = vsel %vm1106_vm3, %v1107_v9, %v1098_v7  ;;  %v1262_v0 = vsel %vm1260_vm4, %v1107_v9, %v1098_v7 }
  0xce   :  { %v1105_v50 = vsel %vm1103_vm6, %v1090_v61, %v1104_v37  ;;  %v1259_v63 = vsel %vm1257_vm9, %v1090_v61, %v1104_v37 }
  0xcf   :  { %v1109_v59 = vsel %vm1102_vm5, %v1105_v50, %v1108_v41  ;;  %v1263_v20 = vsel %vm1256_vm8, %v1259_v63, %v1262_v0 }
  0xd0   :  { %v1110_v34 = vsel %vm1099_vm11, nan, %v1109_v59  ;;  %v1264_v62 = vsel %vm1099_vm11, nan, %v1263_v20 }
  0xd1   :  { %v1281_v11 = vrot.slane %v1110_v34, 6  ;;  %v1284_v4 = vrot.slane %v1264_v62, 3 }
  0xd3   :  { %v1297_v36 = vsel %vm1296_vm7, %v1278_v10, %v1281_v11 }
  0xd4   :  { %v1299_v27 = vsel %vm1298_vm10, %v1297_v36, %v1284_v4 }
  0xd5   :  { %1302 = vxpose.xlu0.b32.end [3/3] (short) %v1299_v27, 128 }
 0x169   :  { %v1316_v12 = vpop.trf.xlu0 }
 0x16a   :  { %1333 = vst.msk [vmem:[%s1973_s1] sm:$0xff] %vm1332_vm2, %v1316_v12 }
 0x171   :  { %v1317_v31 = vpop.trf.xlu0 }
 0x172   :  { %1334 = vst.msk [vmem:[%s1973_s1 + $0x8] sm:$0xff] %vm1332_vm2, %v1317_v31 }
 0x179   :  { %v1318_v25 = vpop.trf.xlu0 }
 0x17a   :  { %1335 = vst.msk [vmem:[%s1973_s1 + $0x10] sm:$0xff] %vm1332_vm2, %v1318_v25 }
 0x181   :  { %v1319_v38 = vpop.trf.xlu0 }
 0x182   :  { %1336 = vst.msk [vmem:[%s1973_s1 + $0x18] sm:$0xff] %vm1332_vm2, %v1319_v38 }
 0x189   :  { %v1320_v29 = vpop.trf.xlu0 }
 0x18a   :  { %1337 = vst.msk [vmem:[%s1973_s1 + $0x20] sm:$0xff] %vm1332_vm2, %v1320_v29 }
 0x191   :  { %v1321_v47 = vpop.trf.xlu0 }
 0x192   :  { %1338 = vst.msk [vmem:[%s1973_s1 + $0x28] sm:$0xff] %vm1332_vm2, %v1321_v47 }
 0x199   :  { %v1322_v60 = vpop.trf.xlu0 }
 0x19a   :  { %1339 = vst.msk [vmem:[%s1973_s1 + $0x30] sm:$0xff] %vm1332_vm2, %v1322_v60 }
 0x1a1   :  { %v1323_v55 = vpop.trf.xlu0 }
 0x1a2   :  { %1340 = vst.msk [vmem:[%s1973_s1 + $0x38] sm:$0xff] %vm1332_vm2, %v1323_v55 }
 0x1a9   :  { %v1324_v10 = vpop.trf.xlu0 }
 0x1aa   :  { %1341 = vst.msk [vmem:[%s1973_s1 + $0x40] sm:$0xff] %vm1332_vm2, %v1324_v10 }
 0x1b1   :  { %v1325_v5 = vpop.trf.xlu0 }
 0x1b2   :  { %1342 = vst.msk [vmem:[%s1973_s1 + $0x48] sm:$0xff] %vm1332_vm2, %v1325_v5 }
 0x1b9   :  { %v1326_v18 = vpop.trf.xlu0 }
 0x1ba   :  { %1343 = vst.msk [vmem:[%s1973_s1 + $0x50] sm:$0xff] %vm1332_vm2, %v1326_v18 }
 0x1c1   :  { %v1327_v52 = vpop.trf.xlu0 }
 0x1c2   :  { %1344 = vst.msk [vmem:[%s1973_s1 + $0x58] sm:$0xff] %vm1332_vm2, %v1327_v52 }
 0x1c9   :  { %v1328_v1 = vpop.trf.xlu0 }
 0x1ca   :  { %1345 = vst.msk [vmem:[%s1973_s1 + $0x60] sm:$0xff] %vm1332_vm2, %v1328_v1 }
 0x1d1   :  { %v1329_v13 = vpop.trf.xlu0 }
 0x1d2   :  { %1346 = vst.msk [vmem:[%s1973_s1 + $0x68] sm:$0xff] %vm1332_vm2, %v1329_v13 }
 0x1d9   :  { %v1330_v42 = vpop.trf.xlu0 }
 0x1da   :  { %1347 = vst.msk [vmem:[%s1973_s1 + $0x70] sm:$0xff] %vm1332_vm2, %v1330_v42 }
 0x1e1   :  { %v1331_v43 = vpop.trf.xlu0 }
 0x1e2   :  { %1348 = vst.msk [vmem:[%s1973_s1 + $0x78] sm:$0xff] %vm1332_vm2, %v1331_v43 }
 0x1e3   :  { %1353 = vsyncpa [#allocation3], 1 }

</bundles_post_ra>
